<compile_context>
chip_gen: v7x
topology: tpu7x:2x2x1
jax: 0.10.0
libtpu: 0.0.40
codegen_flags: <defaults>
</compile_context>

<pallas_src>
import jax
import jax.numpy as jnp
from jax.experimental import pallas as pl
from jax.experimental.pallas import tpu as pltpu

IN_DIM = 784
HID = (256, 128, 64)
OUT = 10
OUT_PAD = 128          # lane-dense output slab; sliced back to 10 in wrapper
MAX_TB = 1024          # max batch-tile rows (still only ~6-8 MiB of VMEM)
SPLIT_AT = 512         # above this, force >= 2 grid steps (v7x dual-TC sharding)


def mlp_kernel(x_ref, w1_ref, b1_ref, w2_ref, b2_ref,
               w3_ref, b3_ref, w4_ref, b4_ref, out_ref):
    # x_ref: (TB, 784) bf16; weights (in, out) bf16; biases (1, out) f32.
    x = x_ref[...]

    # fc1 + ReLU   (dropout = identity in eval mode)
    h = jnp.dot(x, w1_ref[...], preferred_element_type=jnp.float32) + b1_ref[...]
    h = jnp.maximum(h, 0.0)

    # fc2 + ReLU
    h = jnp.dot(h.astype(jnp.bfloat16), w2_ref[...],
                preferred_element_type=jnp.float32) + b2_ref[...]
    h = jnp.maximum(h, 0.0)

    # fc3 + ReLU
    h = jnp.dot(h.astype(jnp.bfloat16), w3_ref[...],
                preferred_element_type=jnp.float32) + b3_ref[...]
    h = jnp.maximum(h, 0.0)

    # fc4 (output lane-padded 10 -> 128)
    z = jnp.dot(h.astype(jnp.bfloat16), w4_ref[...],
                preferred_element_type=jnp.float32) + b4_ref[...]

    # mask the 118 padded classes so they don't pollute the normalizer
    col = jax.lax.broadcasted_iota(jnp.int32, z.shape, 1)
    z = jnp.where(col < OUT, z, -jnp.inf)

    # log_softmax over the class axis (f32 math, bf16 store)
    m = jnp.max(z, axis=-1, keepdims=True)
    s = z - m
    lse = jnp.log(jnp.sum(jnp.exp(s), axis=-1, keepdims=True))
    out_ref[...] = (s - lse).astype(out_ref.dtype)


def _round_up(n, m):
    return ((n + m - 1) // m) * m


def prepare_params(params):
    """One-time param prep: bf16 weights, lane-padded fc4 (hoisted out of fwd)."""
    (w1, b1), (w2, b2), (w3, b3), (w4, b4) = params
    w1p = w1.astype(jnp.bfloat16)                       # (784, 256)
    w2p = w2.astype(jnp.bfloat16)                       # (256, 128)
    w3p = w3.astype(jnp.bfloat16)                       # (128, 64)
    w4p = (jnp.zeros((HID[2], OUT_PAD), jnp.float32)
           .at[:, :OUT].set(w4).astype(jnp.bfloat16))   # (64, 128)
    b4p = jnp.zeros((1, OUT_PAD), jnp.float32).at[:, :OUT].set(b4)
    return (w1p, b1, w2p, b2, w3p, b3, w4p, b4p)


def my_awesome_model(x, prepped):
    """x: (B, 1, 28, 28) or (B, 784) float32.  Returns (B, 10) f32 log-probs."""
    w1p, b1, w2p, b2, w3p, b3, w4p, b4p = prepped
    B = x.shape[0]
    # Single bf16 cast; no f32 padded intermediate, no K padding (K=784 block
    # equals the full minor dim, which Pallas accepts).
    x2d = x.reshape(B, -1).astype(jnp.bfloat16)

    # Batch-tile selection (multiples of 16 for bf16 sublane packing):
    #   small batches  -> one fused tile (grid=1, minimal latency)
    #   larger batches -> >= 2 tiles of up to MAX_TB rows (megacore-shardable)
    b16 = max(_round_up(B, 16), 16)
    if b16 <= SPLIT_AT:
        TB, Bp = b16, b16
    else:
        TB = min(MAX_TB, _round_up(b16 // 2, 16))
        Bp = _round_up(B, TB)

    if Bp == B:
        xp = x2d                                         # no copy at all
    else:
        xp = jnp.zeros((Bp, IN_DIM), jnp.bfloat16).at[:B].set(x2d)

    def resident(a):  # full-array, grid-invariant (stays in VMEM)
        return pl.BlockSpec(a.shape, lambda i: (0, 0))

    out = pl.pallas_call(
        mlp_kernel,
        out_shape=jax.ShapeDtypeStruct((Bp, OUT_PAD), jnp.bfloat16),
        grid=(Bp // TB,),
        in_specs=[
            pl.BlockSpec((TB, IN_DIM), lambda i: (i, 0)),   # streamed x tiles
            resident(w1p), resident(b1),
            resident(w2p), resident(b2),
            resident(w3p), resident(b3),
            resident(w4p), resident(b4p),
        ],
        out_specs=pl.BlockSpec((TB, OUT_PAD), lambda i: (i, 0)),
        compiler_params=pltpu.CompilerParams(
            dimension_semantics=("parallel",)),
    )(xp, w1p, b1, w2p, b2, w3p, b3, w4p, b4p)

    return out[:B, :OUT].astype(jnp.float32)


def init_params(key):
    """Deterministic parameter init (PyTorch-style uniform fan-in bounds)."""
    dims = [784, 256, 128, 64, 10]
    params = []
    for i in range(4):
        fan_in, fan_out = dims[i], dims[i + 1]
        key, kw, kb = jax.random.split(key, 3)
        bound = 1.0 / (fan_in ** 0.5)
        # stored already transposed: (in, out)
        w = jax.random.uniform(kw, (fan_in, fan_out), jnp.float32, -bound, bound)
        b = jax.random.uniform(kb, (1, fan_out), jnp.float32, -bound, bound)
        params.append((w, b))
    return params


def reference(x, params):
    """Pure-JAX f32 reference for correctness checking."""
    B = x.shape[0]
    h = x.reshape(B, -1).astype(jnp.float32)
    (w1, b1), (w2, b2), (w3, b3), (w4, b4) = params
    h = jnp.maximum(h @ w1 + b1, 0.0)
    h = jnp.maximum(h @ w2 + b2, 0.0)
    h = jnp.maximum(h @ w3 + b3, 0.0)
    z = h @ w4 + b4
    return jax.nn.log_softmax(z, axis=1)


if __name__ == "__main__":
    key = jax.random.PRNGKey(0)
    kx, kx2, kp = jax.random.split(key, 3)
    params = init_params(kp)
    prepped = prepare_params(params)         # one-time weight prep (hoisted)
    fwd = jax.jit(my_awesome_model)

    # small MNIST-like batch: (B=8, C=1, H=28, W=28) -> single-tile path
    x = jax.random.normal(kx, (8, 1, 28, 28), jnp.float32)
    out = jax.block_until_ready(fwd(x, prepped))
    ref = reference(x, params)
    assert out.shape == (8, 10)
    assert jnp.allclose(out, ref, atol=5e-2, rtol=5e-2), "mismatch vs reference (B=8)"

    # multi-tile path: grid >= 2 (v7x dual-TC sharding) + padded batch rows
    x2 = jax.random.normal(kx2, (1050, 784), jnp.float32)
    out2 = jax.block_until_ready(fwd(x2, prepped))
    ref2 = reference(x2, params)
    assert out2.shape == (1050, 10)
    assert jnp.allclose(out2, ref2, atol=5e-2, rtol=5e-2), "mismatch vs reference (B=1050)"

    print("KERNEL_OK")
</pallas_src>

<mosaic_0001>
module attributes {stable_mosaic.version = 11 : i64} {
  func.func @mlp_kernel(%arg0: i32, %arg1: memref<16x784xbf16, #tpu.memory_space<vmem>>, %arg2: memref<784x256xbf16, #tpu.memory_space<vmem>>, %arg3: memref<1x256xf32, #tpu.memory_space<vmem>>, %arg4: memref<256x128xbf16, #tpu.memory_space<vmem>>, %arg5: memref<1x128xf32, #tpu.memory_space<vmem>>, %arg6: memref<128x64xbf16, #tpu.memory_space<vmem>>, %arg7: memref<1x64xf32, #tpu.memory_space<vmem>>, %arg8: memref<64x128xbf16, #tpu.memory_space<vmem>>, %arg9: memref<1x128xf32, #tpu.memory_space<vmem>>, %arg10: memref<16x128xbf16, #tpu.memory_space<vmem>>) attributes {dimension_semantics = [#tpu.dimension_semantics<parallel>], iteration_bounds = array<i64: 1>, scalar_prefetch = 0 : i64, scratch_operands = 0 : i64, tpu.core_type = #tpu.core_type<tc>, window_params = [{transform_indices = @transform_0, window_bounds = array<i64: 16, 784>}, {pipeline_mode = #tpu.pipeline_mode<synchronous>, transform_indices = @transform_1, window_bounds = array<i64: 784, 256>}, {pipeline_mode = #tpu.pipeline_mode<synchronous>, transform_indices = @transform_2, window_bounds = array<i64: 1, 256>}, {pipeline_mode = #tpu.pipeline_mode<synchronous>, transform_indices = @transform_3, window_bounds = array<i64: 256, 128>}, {pipeline_mode = #tpu.pipeline_mode<synchronous>, transform_indices = @transform_4, window_bounds = array<i64: 1, 128>}, {pipeline_mode = #tpu.pipeline_mode<synchronous>, transform_indices = @transform_5, window_bounds = array<i64: 128, 64>}, {pipeline_mode = #tpu.pipeline_mode<synchronous>, transform_indices = @transform_6, window_bounds = array<i64: 1, 64>}, {pipeline_mode = #tpu.pipeline_mode<synchronous>, transform_indices = @transform_7, window_bounds = array<i64: 64, 128>}, {pipeline_mode = #tpu.pipeline_mode<synchronous>, transform_indices = @transform_8, window_bounds = array<i64: 1, 128>}, {transform_indices = @transform_9, window_bounds = array<i64: 16, 128>}]} {
    %c0 = arith.constant 0 : index
    %c0_0 = arith.constant 0 : index
    %0 = vector.load %arg1[%c0, %c0_0] : memref<16x784xbf16, #tpu.memory_space<vmem>>, vector<16x784xbf16>
    %c0_1 = arith.constant 0 : index
    %c0_2 = arith.constant 0 : index
    %1 = vector.load %arg2[%c0_1, %c0_2] : memref<784x256xbf16, #tpu.memory_space<vmem>>, vector<784x256xbf16>
    %cst = arith.constant dense<0.000000e+00> : vector<16x256xf32>
    %2 = tpu.matmul %0, %1, %cst {dimension_numbers = #tpu.dot_dimension_numbers<[1], [0], [0], [1], [0, 0, 1, 1], [], []>} : vector<16x784xbf16>, vector<784x256xbf16>, vector<16x256xf32> -> vector<16x256xf32>
    %c0_3 = arith.constant 0 : index
    %c0_4 = arith.constant 0 : index
    %3 = vector.load %arg3[%c0_3, %c0_4] : memref<1x256xf32, #tpu.memory_space<vmem>>, vector<1x256xf32>
    %4 = vector.broadcast %3 : vector<1x256xf32> to vector<16x256xf32>
    %5 = arith.addf %2, %4 : vector<16x256xf32>
    %cst_5 = arith.constant 0.000000e+00 : f32
    %6 = vector.broadcast %cst_5 : f32 to vector<16x256xf32>
    %7 = arith.maximumf %5, %6 : vector<16x256xf32>
    %8 = arith.truncf %7 : vector<16x256xf32> to vector<16x256xbf16>
    %c0_6 = arith.constant 0 : index
    %c0_7 = arith.constant 0 : index
    %9 = vector.load %arg4[%c0_6, %c0_7] : memref<256x128xbf16, #tpu.memory_space<vmem>>, vector<256x128xbf16>
    %cst_8 = arith.constant dense<0.000000e+00> : vector<16x128xf32>
    %10 = tpu.matmul %8, %9, %cst_8 {dimension_numbers = #tpu.dot_dimension_numbers<[1], [0], [0], [1], [0, 0, 1, 1], [], []>} : vector<16x256xbf16>, vector<256x128xbf16>, vector<16x128xf32> -> vector<16x128xf32>
    %c0_9 = arith.constant 0 : index
    %c0_10 = arith.constant 0 : index
    %11 = vector.load %arg5[%c0_9, %c0_10] : memref<1x128xf32, #tpu.memory_space<vmem>>, vector<1x128xf32>
    %12 = vector.broadcast %11 : vector<1x128xf32> to vector<16x128xf32>
    %13 = arith.addf %10, %12 : vector<16x128xf32>
    %cst_11 = arith.constant 0.000000e+00 : f32
    %14 = vector.broadcast %cst_11 : f32 to vector<16x128xf32>
    %15 = arith.maximumf %13, %14 : vector<16x128xf32>
    %16 = arith.truncf %15 : vector<16x128xf32> to vector<16x128xbf16>
    %c0_12 = arith.constant 0 : index
    %c0_13 = arith.constant 0 : index
    %17 = vector.load %arg6[%c0_12, %c0_13] : memref<128x64xbf16, #tpu.memory_space<vmem>>, vector<128x64xbf16>
    %cst_14 = arith.constant dense<0.000000e+00> : vector<16x64xf32>
    %18 = tpu.matmul %16, %17, %cst_14 {dimension_numbers = #tpu.dot_dimension_numbers<[1], [0], [0], [1], [0, 0, 1, 1], [], []>} : vector<16x128xbf16>, vector<128x64xbf16>, vector<16x64xf32> -> vector<16x64xf32>
    %c0_15 = arith.constant 0 : index
    %c0_16 = arith.constant 0 : index
    %19 = vector.load %arg7[%c0_15, %c0_16] : memref<1x64xf32, #tpu.memory_space<vmem>>, vector<1x64xf32>
    %20 = vector.broadcast %19 : vector<1x64xf32> to vector<16x64xf32>
    %21 = arith.addf %18, %20 : vector<16x64xf32>
    %cst_17 = arith.constant 0.000000e+00 : f32
    %22 = vector.broadcast %cst_17 : f32 to vector<16x64xf32>
    %23 = arith.maximumf %21, %22 : vector<16x64xf32>
    %24 = arith.truncf %23 : vector<16x64xf32> to vector<16x64xbf16>
    %c0_18 = arith.constant 0 : index
    %c0_19 = arith.constant 0 : index
    %25 = vector.load %arg8[%c0_18, %c0_19] : memref<64x128xbf16, #tpu.memory_space<vmem>>, vector<64x128xbf16>
    %cst_20 = arith.constant dense<0.000000e+00> : vector<16x128xf32>
    %26 = tpu.matmul %24, %25, %cst_20 {dimension_numbers = #tpu.dot_dimension_numbers<[1], [0], [0], [1], [0, 0, 1, 1], [], []>} : vector<16x64xbf16>, vector<64x128xbf16>, vector<16x128xf32> -> vector<16x128xf32>
    %c0_21 = arith.constant 0 : index
    %c0_22 = arith.constant 0 : index
    %27 = vector.load %arg9[%c0_21, %c0_22] : memref<1x128xf32, #tpu.memory_space<vmem>>, vector<1x128xf32>
    %28 = vector.broadcast %27 : vector<1x128xf32> to vector<16x128xf32>
    %29 = arith.addf %26, %28 : vector<16x128xf32>
    %30 = tpu.iota {dimensions = array<i32: 1>} : vector<16x128xi32>
    %c10_i32 = arith.constant 10 : i32
    %31 = vector.broadcast %c10_i32 : i32 to vector<16x128xi32>
    %32 = arith.cmpi slt, %30, %31 : vector<16x128xi32>
    %cst_23 = arith.constant 0xFF800000 : f32
    %33 = vector.broadcast %cst_23 : f32 to vector<16x128xf32>
    %34 = arith.select %32, %29, %33 : vector<16x128xi1>, vector<16x128xf32>
    %cst_24 = arith.constant dense<0xFF800000> : vector<16xf32>
    %35 = vector.multi_reduction <maximumf>, %34, %cst_24 [1] : vector<16x128xf32> to vector<16xf32>
    %36 = vector.shape_cast %35 : vector<16xf32> to vector<16x1xf32>
    %37 = vector.broadcast %36 : vector<16x1xf32> to vector<16x128xf32>
    %38 = arith.subf %34, %37 : vector<16x128xf32>
    %39 = math.exp %38 : vector<16x128xf32>
    %cst_25 = arith.constant dense<0.000000e+00> : vector<16xf32>
    %40 = vector.multi_reduction <add>, %39, %cst_25 [1] : vector<16x128xf32> to vector<16xf32>
    %41 = vector.shape_cast %40 : vector<16xf32> to vector<16x1xf32>
    %42 = math.log %41 : vector<16x1xf32>
    %43 = vector.broadcast %42 : vector<16x1xf32> to vector<16x128xf32>
    %44 = arith.subf %38, %43 : vector<16x128xf32>
    %45 = arith.truncf %44 : vector<16x128xf32> to vector<16x128xbf16>
    %c0_26 = arith.constant 0 : index
    %c0_27 = arith.constant 0 : index
    %46 = vector.load %arg10[%c0_26, %c0_27] : memref<16x128xbf16, #tpu.memory_space<vmem>>, vector<16x128xbf16>
    tpu.vector_store %arg10[%c0_26, %c0_27], %45 {strides = array<i32>} : memref<16x128xbf16, #tpu.memory_space<vmem>>, vector<16x128xbf16>,
    return
  }
  func.func @transform_0(%arg0: i32) -> (i32, i32) {
    %c0_i32 = arith.constant 0 : i32
    %c0_i32_0 = arith.constant 0 : i32
    return %arg0, %c0_i32 : i32, i32
  }
  func.func @transform_1(%arg0: i32) -> (i32, i32) {
    %c0_i32 = arith.constant 0 : i32
    %c0_i32_0 = arith.constant 0 : i32
    %c0_i32_1 = arith.constant 0 : i32
    return %c0_i32, %c0_i32_0 : i32, i32
  }
  func.func @transform_2(%arg0: i32) -> (i32, i32) {
    %c0_i32 = arith.constant 0 : i32
    %c0_i32_0 = arith.constant 0 : i32
    %c0_i32_1 = arith.constant 0 : i32
    return %c0_i32, %c0_i32_0 : i32, i32
  }
  func.func @transform_3(%arg0: i32) -> (i32, i32) {
    %c0_i32 = arith.constant 0 : i32
    %c0_i32_0 = arith.constant 0 : i32
    %c0_i32_1 = arith.constant 0 : i32
    return %c0_i32, %c0_i32_0 : i32, i32
  }
  func.func @transform_4(%arg0: i32) -> (i32, i32) {
    %c0_i32 = arith.constant 0 : i32
    %c0_i32_0 = arith.constant 0 : i32
    %c0_i32_1 = arith.constant 0 : i32
    return %c0_i32, %c0_i32_0 : i32, i32
  }
  func.func @transform_5(%arg0: i32) -> (i32, i32) {
    %c0_i32 = arith.constant 0 : i32
    %c0_i32_0 = arith.constant 0 : i32
    %c0_i32_1 = arith.constant 0 : i32
    return %c0_i32, %c0_i32_0 : i32, i32
  }
  func.func @transform_6(%arg0: i32) -> (i32, i32) {
    %c0_i32 = arith.constant 0 : i32
    %c0_i32_0 = arith.constant 0 : i32
    %c0_i32_1 = arith.constant 0 : i32
    return %c0_i32, %c0_i32_0 : i32, i32
  }
  func.func @transform_7(%arg0: i32) -> (i32, i32) {
    %c0_i32 = arith.constant 0 : i32
    %c0_i32_0 = arith.constant 0 : i32
    %c0_i32_1 = arith.constant 0 : i32
    return %c0_i32, %c0_i32_0 : i32, i32
  }
  func.func @transform_8(%arg0: i32) -> (i32, i32) {
    %c0_i32 = arith.constant 0 : i32
    %c0_i32_0 = arith.constant 0 : i32
    %c0_i32_1 = arith.constant 0 : i32
    return %c0_i32, %c0_i32_0 : i32, i32
  }
  func.func @transform_9(%arg0: i32) -> (i32, i32) {
    %c0_i32 = arith.constant 0 : i32
    %c0_i32_0 = arith.constant 0 : i32
    return %arg0, %c0_i32 : i32, i32
  }
}

</mosaic_0001>

<bundles_post_ra>
// kernel: my_awesome_model.1
= control target key start
LH: loop header
LB: loop body
LE: loop exit
PB: predicated region body
PF: predicated region fallthrough
CT: control target
= control target key end

     0   :  { %14 = vsyncpa [#allocation3], 0  ;;  %s1744_s30 = smov [#allocation2]   ;;  %s1950_s0 = inlined_call_operand.vmem [shape: bf16[16,784], index: 0, kind: input, shape index: {}]   ;;  %s1951_s1 = inlined_call_operand.hbm [shape: bf16[784,256], index: 1, kind: input, shape index: {}]   ;;  %s1952_s2 = inlined_call_operand.vmem [shape: f32[1,256], index: 2, kind: input, shape index: {}]   ;;  %s1953_s3 = inlined_call_operand.vmem [shape: bf16[256,128], index: 3, kind: input, shape index: {}]   ;;  %s1954_s4 = inlined_call_operand.vmem [shape: f32[1,128], index: 4, kind: input, shape index: {}]   ;;  %s1955_s5 = inlined_call_operand.vmem [shape: bf16[128,64], index: 5, kind: input, shape index: {}]   ;;  %s1956_s6 = inlined_call_operand.vmem [shape: f32[1,64], index: 6, kind: input, shape index: {}]   ;;  %s1957_s7 = inlined_call_operand.vmem [shape: bf16[64,128], index: 7, kind: input, shape index: {}]   ;;  %s1958_s8 = inlined_call_operand.vmem [shape: f32[1,128], index: 8, kind: input, shape index: {}]   ;;  %s1959_s9 = inlined_call_operand.vmem [shape: bf16[16,128], index: 9, kind: output, shape index: {}]  }
   0x1   :  { %s22_s10 = sshll.u32 %s1744_s30, 4  ;;  %s1720_s13 = scalar_lea.hbm %s1951_s1, 12544  ;;  %s23_s10 = int_to_ptr.vmem [resolvable:$true] %s22_s10 }
   0x2   :  { %p1721_p0 = scmp.ne.s32.totalorder %s1951_s1, %s1720_s13  ;;  %p1724_p1 = scmp.lt.u32.totalorder %s1720_s13, %s1951_s1 }
   0x4   :  { %p1726_p2 = pnand %p1724_p1, %p1721_p0 }
   0x6   :  { %1729 = shalt.err (!%p1726_p2)
}
   0x7   :  { %s1730_s18 = scalar_lea.vmem %s23_s10, 12544  ;;  %p1735_p4 = scmp.lt.s32.totalorder %s23_s10, %s23_s10 }
   0x8   :  { %p1731_p3 = scmp.ne.s32.totalorder %s23_s10, %s1730_s18  ;;  %p1736_p5 = scmp.lt.s32.totalorder %s1730_s18, %s1730_s18 }
   0xa   :  { %p1737_p6 = por %p1736_p5, %p1735_p4 }
   0xc   :  { %p1738_p7 = pnand %p1737_p6, %p1731_p3 }
   0xe   :  { %1741 = shalt.err (!%p1738_p7)
}
   0xf   :  { %s1745_s19 = smov 128   ;;  %s1746_s20 = smov 8  }
  0x10   :  { %28 = dma.hbm_to_vmem [thread:$0]  %s1951_s1, 12544, %s23_s10, [#allocation3], %s1745_s19, %s1745_s19, %s1746_s20  }
  0x11   :  { %1742 = dma.done.wait [#allocation3], 12544  }
  0x12   :  { %1743 = vsyncadd [#allocation3], 4294954752  ;;  %v1527_v0 = vld [vmem:[#allocation2 + $0x104] ss:$8 sps:$4 sm:$0xff]   ;;  %v1529_v1 = vld [vmem:[#allocation2 + $0x100] ss:$8 sps:$4 sm:$0xff]  }
  0x13   :  { %737 = vmatprep.subr.bf16.mxu0 %v1527_v0  ;;  %v1530_v2 = vld [vmem:[#allocation2 + $0x114] ss:$8 sps:$4 sm:$0xff]   ;;  %v1532_v3 = vld [vmem:[#allocation2 + $0x110] ss:$8 sps:$4 sm:$0xff]   ;;  %v1533_v4 = vld [vmem:[#allocation2 + $0x124] ss:$8 sps:$4 sm:$0xff]  }
  0x14   :  { %738 = vmatpush1.bf16.msra.mxu0 %v1529_v1  ;;  %v1535_v5 = vld [vmem:[#allocation2 + $0x120] ss:$8 sps:$4 sm:$0xff]   ;;  %v1536_v6 = vld [vmem:[#allocation2 + $0x134] ss:$8 sps:$4 sm:$0xff]   ;;  %v1538_v7 = vld [vmem:[#allocation2 + $0x130] ss:$8 sps:$4 sm:$0xff]  }
  0x15   :  { %739 = vmatprep.subr.bf16.mxu0 %v1530_v2  ;;  %v1539_v8 = vld [vmem:[#allocation2 + $0x144] ss:$8 sps:$4 sm:$0xff]   ;;  %v1541_v9 = vld [vmem:[#allocation2 + $0x140] ss:$8 sps:$4 sm:$0xff]   ;;  %v1542_v10 = vld [vmem:[#allocation2 + $0x154] ss:$8 sps:$4 sm:$0xff]  }
  0x16   :  { %v1544_v11 = vld [vmem:[#allocation2 + $0x150] ss:$8 sps:$4 sm:$0xff]   ;;  %v1545_v12 = vld [vmem:[#allocation2 + $0x164] ss:$8 sps:$4 sm:$0xff]   ;;  %v1547_v14 = vld [vmem:[#allocation2 + $0x160] ss:$8 sps:$4 sm:$0xff]  }
  0x17   :  { %v1577_v13 = vld [vmem:[%s1950_s0 + $0xc] ss:$28 sps:$4 sm:$0xff]   ;;  %v1548_v15 = vld [vmem:[#allocation2 + $0x174] ss:$8 sps:$4 sm:$0xff]   ;;  %v1550_v17 = vld [vmem:[#allocation2 + $0x170] ss:$8 sps:$4 sm:$0xff]  }
  0x18   :  { %740 = vmatpush1.bf16.msra.mxu0 %v1532_v3  ;;  %769 = vmatprep.mubr.bf16.mxu0 %v1577_v13  ;;  %v1584_v16 = vld [vmem:[#allocation2 + $0x4] ss:$8 sps:$4 sm:$0xff]   ;;  %v1589_v19 = vld [vmem:[#allocation2] ss:$8 sps:$4 sm:$0xff]   ;;  %v1590_v20 = vld [vmem:[#allocation2 + $0x14] ss:$8 sps:$4 sm:$0xff]  }
  0x19   :  { %741 = vmatprep.subr.bf16.mxu0 %v1533_v4  ;;  %v1551_v18 = vld [vmem:[#allocation2 + $0x184] ss:$8 sps:$4 sm:$0xff]   ;;  %694 = vmatprep.subr.bf16.mxu1 %v1584_v16  ;;  %v1553_v21 = vld [vmem:[#allocation2 + $0x180] ss:$8 sps:$4 sm:$0xff]   ;;  %v1595_v22 = vld [vmem:[#allocation2 + $0x10] ss:$8 sps:$4 sm:$0xff]  }
  0x1a   :  { %695 = vmatpush1.bf16.msra.mxu1 %v1589_v19  ;;  %v1596_v23 = vld [vmem:[#allocation2 + $0x24] ss:$8 sps:$4 sm:$0xff]   ;;  %v1554_v24 = vld [vmem:[#allocation2 + $0x194] ss:$8 sps:$4 sm:$0xff]   ;;  %v1601_v25 = vld [vmem:[#allocation2 + $0x20] ss:$8 sps:$4 sm:$0xff]  }
  0x1b   :  { %696 = vmatprep.subr.bf16.mxu1 %v1590_v20  ;;  %v1602_v26 = vld [vmem:[#allocation2 + $0x34] ss:$8 sps:$4 sm:$0xff]   ;;  %v1556_v27 = vld [vmem:[#allocation2 + $0x190] ss:$8 sps:$4 sm:$0xff]   ;;  %v1557_v28 = vld [vmem:[#allocation2 + $0x1a4] ss:$8 sps:$4 sm:$0xff]  }
  0x1c   :  { %742 = vmatpush1.bf16.msra.mxu0 %v1535_v5  ;;  %v1607_v29 = vld [vmem:[#allocation2 + $0x30] ss:$8 sps:$4 sm:$0xff]   ;;  %v1608_v30 = vld [vmem:[#allocation2 + $0x44] ss:$8 sps:$4 sm:$0xff]   ;;  %v1559_v31 = vld [vmem:[#allocation2 + $0x1a0] ss:$8 sps:$4 sm:$0xff]  }
  0x1d   :  { %743 = vmatprep.subr.bf16.mxu0 %v1536_v6  ;;  %v1560_v32 = vld [vmem:[#allocation2 + $0x1b4] ss:$8 sps:$4 sm:$0xff]   ;;  %v1613_v33 = vld [vmem:[#allocation2 + $0x40] ss:$8 sps:$4 sm:$0xff]   ;;  %v1562_v35 = vld [vmem:[#allocation2 + $0x1b0] ss:$8 sps:$4 sm:$0xff]  }
  0x1e   :  { %697 = vmatpush1.bf16.msra.mxu1 %v1595_v22  ;;  %v1614_v34 = vld [vmem:[#allocation2 + $0x54] ss:$8 sps:$4 sm:$0xff]   ;;  %v1563_v36 = vld [vmem:[#allocation2 + $0x1c4] ss:$8 sps:$4 sm:$0xff]   ;;  %v1619_v37 = vld [vmem:[#allocation2 + $0x50] ss:$8 sps:$4 sm:$0xff]  }
  0x1f   :  { %698 = vmatprep.subr.bf16.mxu1 %v1596_v23  ;;  %v1620_v38 = vld [vmem:[#allocation2 + $0x64] ss:$8 sps:$4 sm:$0xff]   ;;  %v1565_v39 = vld [vmem:[#allocation2 + $0x1c0] ss:$8 sps:$4 sm:$0xff]   ;;  %v1566_v40 = vld [vmem:[#allocation2 + $0x1d4] ss:$8 sps:$4 sm:$0xff]  }
  0x20   :  { %744 = vmatpush1.bf16.msra.mxu0 %v1538_v7  ;;  %v1625_v41 = vld [vmem:[#allocation2 + $0x60] ss:$8 sps:$4 sm:$0xff]   ;;  %v1626_v42 = vld [vmem:[#allocation2 + $0x74] ss:$8 sps:$4 sm:$0xff]   ;;  %v1568_v43 = vld [vmem:[#allocation2 + $0x1d0] ss:$8 sps:$4 sm:$0xff]  }
  0x21   :  { %745 = vmatprep.subr.bf16.mxu0 %v1539_v8  ;;  %v1569_v44 = vld [vmem:[#allocation2 + $0x1e4] ss:$8 sps:$4 sm:$0xff]   ;;  %v1631_v45 = vld [vmem:[#allocation2 + $0x70] ss:$8 sps:$4 sm:$0xff]   ;;  %v1571_v47 = vld [vmem:[#allocation2 + $0x1e0] ss:$8 sps:$4 sm:$0xff]  }
  0x22   :  { %699 = vmatpush1.bf16.msra.mxu1 %v1601_v25  ;;  %v1632_v46 = vld [vmem:[#allocation2 + $0x84] ss:$8 sps:$4 sm:$0xff]   ;;  %v1572_v48 = vld [vmem:[#allocation2 + $0x1f4] ss:$8 sps:$4 sm:$0xff]   ;;  %v1637_v49 = vld [vmem:[#allocation2 + $0x80] ss:$8 sps:$4 sm:$0xff]  }
  0x23   :  { %700 = vmatprep.subr.bf16.mxu1 %v1602_v26  ;;  %v1638_v50 = vld [vmem:[#allocation2 + $0x94] ss:$8 sps:$4 sm:$0xff]   ;;  %v1574_v51 = vld [vmem:[#allocation2 + $0x1f0] ss:$8 sps:$4 sm:$0xff]   ;;  %v1580_v52 = vld [vmem:[#allocation2 + $0x204] ss:$8 sps:$4 sm:$0xff]  }
  0x24   :  { %746 = vmatpush1.bf16.msra.mxu0 %v1541_v9  ;;  %v1643_v53 = vld [vmem:[#allocation2 + $0x90] ss:$8 sps:$4 sm:$0xff]   ;;  %v1575_v54 = vld [vmem:[%s1950_s0 + $0x8] ss:$28 sps:$4 sm:$0xff]   ;;  %v1583_v58 = vld [vmem:[#allocation2 + $0x214] ss:$8 sps:$4 sm:$0xff]  }
  0x25   :  { %747 = vmatprep.subr.bf16.mxu0 %v1542_v10  ;;  %v1644_v55 = vld [vmem:[#allocation2 + $0xa4] ss:$8 sps:$4 sm:$0xff]   ;;  %v1578_v56 = vld [vmem:[#allocation2 + $0x200] ss:$8 sps:$4 sm:$0xff]   ;;  %v1670_v57 = vld [vmem:[%s1950_s0 + $0x14] ss:$28 sps:$4 sm:$0xff]  }
  0x26   :  { %701 = vmatpush1.bf16.msra.mxu1 %v1607_v29  ;;  %v1649_v59 = vld [vmem:[#allocation2 + $0xa0] ss:$8 sps:$4 sm:$0xff]   ;;  %v1650_v60 = vld [vmem:[#allocation2 + $0xb4] ss:$8 sps:$4 sm:$0xff]   ;;  %v1581_v61 = vld [vmem:[#allocation2 + $0x210] ss:$8 sps:$4 sm:$0xff]  }
  0x27   :  { %702 = vmatprep.subr.bf16.mxu1 %v1608_v30  ;;  %v1588_v62 = vld [vmem:[#allocation2 + $0x224] ss:$8 sps:$4 sm:$0xff]   ;;  %v1655_v63 = vld [vmem:[#allocation2 + $0xb0] ss:$8 sps:$4 sm:$0xff]   ;;  %v1586_v2 = vld [vmem:[#allocation2 + $0x220] ss:$8 sps:$4 sm:$0xff]  }
  0x28   :  { %748 = vmatpush1.bf16.msra.mxu0 %v1544_v11  ;;  %v1682_v0 = vld [vmem:[%s1950_s0 + $0x4] ss:$28 sps:$4 sm:$0xff]   ;;  %v1594_v3 = vld [vmem:[#allocation2 + $0x234] ss:$8 sps:$4 sm:$0xff]   ;;  %v1592_v6 = vld [vmem:[#allocation2 + $0x230] ss:$8 sps:$4 sm:$0xff]  }
  0x29   :  { %749 = vmatprep.subr.bf16.mxu0 %v1545_v12  ;;  %v1656_v1 = vld [vmem:[#allocation2 + $0xc4] ss:$8 sps:$4 sm:$0xff]   ;;  %726 = vmatprep.mubr.bf16.mxu1 %v1682_v0  ;;  %v1661_v4 = vld [vmem:[#allocation2 + $0xc0] ss:$8 sps:$4 sm:$0xff]   ;;  %v1662_v5 = vld [vmem:[#allocation2 + $0xd4] ss:$8 sps:$4 sm:$0xff]  }
  0x2a   :  { %703 = vmatpush1.bf16.msra.mxu1 %v1613_v33  ;;  %v1600_v7 = vld [vmem:[#allocation2 + $0x244] ss:$8 sps:$4 sm:$0xff]   ;;  %v1598_v8 = vld [vmem:[#allocation2 + $0x240] ss:$8 sps:$4 sm:$0xff]   ;;  %v1667_v9 = vld [vmem:[#allocation2 + $0xd0] ss:$8 sps:$4 sm:$0xff]  }
  0x2b   :  { %704 = vmatprep.subr.bf16.mxu1 %v1614_v34  ;;  %v1671_v10 = vld [vmem:[#allocation2 + $0xe4] ss:$8 sps:$4 sm:$0xff]   ;;  %v1606_v11 = vld [vmem:[#allocation2 + $0x254] ss:$8 sps:$4 sm:$0xff]   ;;  %v1676_v12 = vld [vmem:[#allocation2 + $0xe0] ss:$8 sps:$4 sm:$0xff]  }
  0x2c   :  { %750 = vmatpush1.bf16.msra.mxu0 %v1547_v14  ;;  %v1677_v13 = vld [vmem:[#allocation2 + $0xf4] ss:$8 sps:$4 sm:$0xff]   ;;  %v1604_v14 = vld [vmem:[#allocation2 + $0x250] ss:$8 sps:$4 sm:$0xff]   ;;  %v1686_v22 = vld [vmem:[%s1953_s3 + $0x48] sm:$0xff]   ;;  %vm690_vm0 = vcmask 130048  }
  0x2d   :  { %751 = vmatprep.subr.bf16.mxu0 %v1548_v15  ;;  %v1612_v15 = vld [vmem:[#allocation2 + $0x264] ss:$8 sps:$4 sm:$0xff]   ;;  %v1679_v16 = vld [vmem:[#allocation2 + $0xf0] ss:$8 sps:$4 sm:$0xff]   ;;  %v1618_v19 = vld [vmem:[#allocation2 + $0x274] ss:$8 sps:$4 sm:$0xff]  }
  0x2e   :  { %705 = vmatpush1.bf16.msra.mxu1 %v1619_v37  ;;  %v1680_v20 = vld [vmem:[%s1950_s0] ss:$28 sps:$4 sm:$0xff]   ;;  %v1616_v23 = vld [vmem:[#allocation2 + $0x270] ss:$8 sps:$4 sm:$0xff]   ;;  %v1687_v25 = vld [vmem:[%s1953_s3 + $0x8] sm:$0xff]   ;;  %vm1749_vm1 = vmmov 0  }
  0x2f   :  { %706 = vmatprep.subr.bf16.mxu1 %v1620_v38  ;;  %v1688_v26 = vld [vmem:[%s1953_s3 + $0x50] sm:$0xff]   ;;  %v1690_v30 = vld [vmem:[%s1953_s3 + $0x58] sm:$0xff]   ;;  %v1692_v34 = vld [vmem:[%s1953_s3 + $0x60] sm:$0xff]   ;;  %vm1205_vm2 = vcmask 523264  }
  0x30   :  { %752 = vmatpush1.bf16.msra.mxu0 %v1550_v17  ;;  %v1684_v17 = vld [vmem:[%s1953_s3 + $0x40] sm:$0xff]   ;;  %v1689_v29 = vld [vmem:[%s1953_s3 + $0x10] sm:$0xff]   ;;  %v1691_v33 = vld [vmem:[%s1953_s3 + $0x18] sm:$0xff]  }
  0x31   :  { %753 = vmatprep.subr.bf16.mxu0 %v1551_v18  ;;  %v1610_v18 = vld [vmem:[#allocation2 + $0x260] ss:$8 sps:$4 sm:$0xff]   ;;  %v1640_v37 = vld [vmem:[#allocation2 + $0x2b0] ss:$8 sps:$4 sm:$0xff]   ;;  %v1648_v38 = vld [vmem:[#allocation2 + $0x2c4] ss:$8 sps:$4 sm:$0xff]  }
  0x32   :  { %707 = vmatpush1.bf16.msra.mxu1 %v1625_v41  ;;  %v1652_v41 = vld [vmem:[#allocation2 + $0x2d0] ss:$8 sps:$4 sm:$0xff]  }
  0x33   :  { %708 = vmatprep.subr.bf16.mxu1 %v1626_v42  ;;  %v1660_v42 = vld [vmem:[#allocation2 + $0x2e4] ss:$8 sps:$4 sm:$0xff]  }
  0x34   :  { %754 = vmatpush1.bf16.msra.mxu0 %v1553_v21  ;;  %v1685_v21 = vld [vmem:[%s1953_s3] sm:$0xff]  }
  0x35   :  { %755 = vmatprep.subr.bf16.mxu0 %v1554_v24  ;;  %v1624_v24 = vld [vmem:[#allocation2 + $0x284] ss:$8 sps:$4 sm:$0xff]  }
  0x36   :  { %709 = vmatpush1.bf16.msra.mxu1 %v1631_v45  ;;  %v1664_v45 = vld [vmem:[#allocation2 + $0x2f0] ss:$8 sps:$4 sm:$0xff]  }
  0x37   :  { %710 = vmatprep.subr.bf16.mxu1 %v1632_v46  ;;  %v1675_v46 = vld [vmem:[#allocation2 + $0x304] ss:$8 sps:$4 sm:$0xff]  }
  0x38   :  { %756 = vmatpush1.bf16.msra.mxu0 %v1556_v27  ;;  %v1622_v27 = vld [vmem:[#allocation2 + $0x280] ss:$8 sps:$4 sm:$0xff]  }
  0x39   :  { %757 = vmatprep.subr.bf16.mxu0 %v1557_v28  ;;  %v1630_v28 = vld [vmem:[#allocation2 + $0x294] ss:$8 sps:$4 sm:$0xff]  }
  0x3a   :  { %711 = vmatpush1.bf16.msra.mxu1 %v1637_v49  ;;  %v1747_v49 = vmov 0  }
  0x3b   :  { %712 = vmatprep.subr.bf16.mxu1 %v1638_v50  ;;  %v1683_v50 = vld [vmem:[%s1950_s0 + $0x18] ss:$28 sps:$4 sm:$0xff]  }
  0x3c   :  { %758 = vmatpush1.bf16.msra.mxu0 %v1559_v31  ;;  %v1628_v31 = vld [vmem:[#allocation2 + $0x290] ss:$8 sps:$4 sm:$0xff]  }
  0x3d   :  { %759 = vmatprep.subr.bf16.mxu0 %v1560_v32  ;;  %v1636_v32 = vld [vmem:[#allocation2 + $0x2a4] ss:$8 sps:$4 sm:$0xff]  }
  0x3e   :  { %713 = vmatpush1.bf16.msra.mxu1 %v1643_v53  ;;  %v1695_v53 = vld [vmem:[%s1953_s3 + $0x28] sm:$0xff]  }
  0x3f   :  { %714 = vmatprep.subr.bf16.mxu1 %v1644_v55  ;;  %v1697_v55 = vld [vmem:[%s1953_s3 + $0x30] sm:$0xff]  }
  0x40   :  { %760 = vmatpush1.bf16.msra.mxu0 %v1562_v35  ;;  %v1634_v35 = vld [vmem:[#allocation2 + $0x2a0] ss:$8 sps:$4 sm:$0xff]  }
  0x41   :  { %761 = vmatprep.subr.bf16.mxu0 %v1563_v36  ;;  %v1642_v36 = vld [vmem:[#allocation2 + $0x2b4] ss:$8 sps:$4 sm:$0xff]  }
  0x42   :  { %715 = vmatpush1.bf16.msra.mxu1 %v1649_v59 }
  0x43   :  { %716 = vmatprep.subr.bf16.mxu1 %v1650_v60 }
  0x44   :  { %762 = vmatpush1.bf16.msra.mxu0 %v1565_v39  ;;  %v1646_v39 = vld [vmem:[#allocation2 + $0x2c0] ss:$8 sps:$4 sm:$0xff]  }
  0x45   :  { %763 = vmatprep.subr.bf16.mxu0 %v1566_v40  ;;  %v1654_v40 = vld [vmem:[#allocation2 + $0x2d4] ss:$8 sps:$4 sm:$0xff]  }
  0x46   :  { %717 = vmatpush1.bf16.msra.mxu1 %v1655_v63  ;;  %v155_v63 = vlaneseq }
  0x47   :  { %718 = vmatprep.subr.bf16.mxu1 %v1656_v1 }
  0x48   :  { %764 = vmatpush1.bf16.msra.mxu0 %v1568_v43  ;;  %v1658_v43 = vld [vmem:[#allocation2 + $0x2e0] ss:$8 sps:$4 sm:$0xff]   ;;  %v156_v0 = vshrl.u32 %v155_v63, 7 }
  0x49   :  { %765 = vmatprep.subr.bf16.mxu0 %v1569_v44  ;;  %v1666_v44 = vld [vmem:[#allocation2 + $0x2f4] ss:$8 sps:$4 sm:$0xff]  }
  0x4a   :  { %719 = vmatpush1.bf16.msra.mxu1 %v1661_v4  ;;  %v157_v1 = vsub.s32 0, %v156_v0 }
  0x4b   :  { %720 = vmatprep.subr.bf16.mxu1 %v1662_v5 }
  0x4c   :  { %766 = vmatpush1.bf16.msra.mxu0 %v1571_v47  ;;  %v1668_v47 = vld [vmem:[%s1950_s0 + $0x10] ss:$28 sps:$4 sm:$0xff]  }
  0x4d   :  { %767 = vmatprep.subr.bf16.mxu0 %v1572_v48  ;;  %v1673_v48 = vld [vmem:[#allocation2 + $0x300] ss:$8 sps:$4 sm:$0xff]  }
  0x4e   :  { %721 = vmatpush1.bf16.msra.mxu1 %v1667_v9 }
  0x4f   :  { %722 = vmatprep.subr.bf16.mxu1 %v1671_v10 }
  0x50   :  { %768 = vmatpush1.bf16.msra.mxu0 %v1574_v51  ;;  %v1693_v51 = vld [vmem:[%s1953_s3 + $0x20] sm:$0xff]  }
  0x51   :  { %780 = vmatprep.subr.bf16.mxu0 %v1580_v52  ;;  %v1694_v52 = vld [vmem:[%s1953_s3 + $0x68] sm:$0xff]  }
  0x52   :  { %723 = vmatpush1.bf16.msra.mxu1 %v1676_v12 }
  0x53   :  { %770 = vmatmul.mubr.bf16.vlgmr.msra.gmra.mrb[0].mxu0 %v1575_v54  ;;  %724 = vmatprep.subr.bf16.mxu1 %v1677_v13  ;;  %v1696_v54 = vld [vmem:[%s1953_s3 + $0x70] sm:$0xff]  }
  0x54   :  { %781 = vmatpush1.bf16.msra.mxu0 %v1578_v56  ;;  %812 = vmatprep.mubr.bf16.mxu0 %v1670_v57  ;;  %v1698_v56 = vld [vmem:[%s1953_s3 + $0x78] sm:$0xff]  }
  0x55   :  { %782 = vmatprep.subr.bf16.mxu0 %v1583_v58  ;;  %v1699_v57 = vld [vmem:[%s1953_s3 + $0x38] sm:$0xff]   ;;  %v1748_v58 = vmov 0.0  }
  0x56   :  { %725 = vmatpush1.bf16.msra.mxu1 %v1679_v16 }
  0x57   :  { %1437 = vmatprep.subr.bf16.mxu1 %v1684_v17 }
  0x58   :  { %783 = vmatpush1.bf16.msra.mxu0 %v1581_v61 }
  0x59   :  { %784 = vmatprep.subr.bf16.mxu0 %v1588_v62  ;;  %727 = vmatmul.mubr.bf16.vlgmr.msra.gmra.mrb[0].mxu1 %v1680_v20 }
  0x5a   :  { %1438 = vmatpush3.bf16.msra.mxu1 %v1685_v21 }
  0x5b   :  { %1439 = vmatprep.subr.bf16.mxu1 %v1686_v22 }
  0x5c   :  { %785 = vmatpush1.bf16.msra.mxu0 %v1586_v2  ;;  %v153_v2 = vld [vmem:[%s1952_s2] sm:$0x3] }
  0x5d   :  { %786 = vmatprep.subr.bf16.mxu0 %v1594_v3  ;;  %v161_v3 = vsub.s32 1, %v156_v0  ;;  %v158_v4 = vrot.slane %v153_v2, %v157_v1 }
  0x5e   :  { %1440 = vmatpush3.bf16.msra.mxu1 %v1687_v25  ;;  %v1701_v25 = vld [vmem:[%s1955_s5 + $0x8] sm:$0xff]  }
  0x5f   :  { %1441 = vmatprep.subr.bf16.mxu1 %v1688_v26  ;;  %v162_v5 = vrot.slane %v153_v2, %v161_v3  ;;  %v1702_v26 = vld [vmem:[%s1955_s5 + $0x10] sm:$0xff]  }
  0x60   :  { %787 = vmatpush1.bf16.msra.mxu0 %v1592_v6 }
  0x61   :  { %788 = vmatprep.subr.bf16.mxu0 %v1600_v7 }
  0x62   :  { %1442 = vmatpush3.bf16.msra.mxu1 %v1689_v29  ;;  %v1705_v29 = vld [vmem:[%s1955_s5 + $0x28] sm:$0xff]  }
  0x63   :  { %1443 = vmatprep.subr.bf16.mxu1 %v1690_v30  ;;  %v1706_v30 = vld [vmem:[%s1955_s5 + $0x30] sm:$0xff]  }
  0x64   :  { %789 = vmatpush1.bf16.msra.mxu0 %v1598_v8 }
  0x65   :  { %790 = vmatprep.subr.bf16.mxu0 %v1606_v11 }
  0x66   :  { %1444 = vmatpush3.bf16.msra.mxu1 %v1691_v33  ;;  %v1396_v33 = vld [vmem:[%s1954_s4] ss:$0 sm:$0xff] }
  0x67   :  { %1445 = vmatprep.subr.bf16.mxu1 %v1692_v34 }
  0x68   :  { %791 = vmatpush1.bf16.msra.mxu0 %v1604_v14 }
  0x69   :  { %792 = vmatprep.subr.bf16.mxu0 %v1612_v15 }
  0x6a   :  { %1446 = vmatpush3.bf16.msra.mxu1 %v1693_v51 }
  0x6b   :  { %1447 = vmatprep.subr.bf16.mxu1 %v1694_v52 }
  0x6c   :  { %793 = vmatpush1.bf16.msra.mxu0 %v1610_v18 }
  0x6d   :  { %794 = vmatprep.subr.bf16.mxu0 %v1618_v19 }
  0x6e   :  { %1448 = vmatpush3.bf16.msra.mxu1 %v1695_v53 }
  0x6f   :  { %1449 = vmatprep.subr.bf16.mxu1 %v1696_v54 }
  0x70   :  { %795 = vmatpush1.bf16.msra.mxu0 %v1616_v23 }
  0x71   :  { %796 = vmatprep.subr.bf16.mxu0 %v1624_v24  ;;  %v1700_v24 = vld [vmem:[%s1955_s5] sm:$0xff]  }
  0x72   :  { %1450 = vmatpush3.bf16.msra.mxu1 %v1697_v55 }
  0x73   :  { %1451 = vmatprep.subr.bf16.mxu1 %v1698_v56 }
  0x74   :  { %797 = vmatpush1.bf16.msra.mxu0 %v1622_v27  ;;  %v1703_v27 = vld [vmem:[%s1955_s5 + $0x18] sm:$0xff]  }
  0x75   :  { %798 = vmatprep.subr.bf16.mxu0 %v1630_v28  ;;  %v1704_v28 = vld [vmem:[%s1955_s5 + $0x20] sm:$0xff]  }
  0x76   :  { %1452 = vmatpush3.bf16.msra.mxu1 %v1699_v57 }
  0x77   :  { %1473 = vmatprep.subr.bf16.mxu1 %v1748_v58 }
  0x78   :  { %799 = vmatpush1.bf16.msra.mxu0 %v1628_v31  ;;  %v1707_v31 = vld [vmem:[%s1955_s5 + $0x38] sm:$0xff]  }
  0x79   :  { %800 = vmatprep.subr.bf16.mxu0 %v1636_v32 }
  0x7c   :  { %801 = vmatpush1.bf16.msra.mxu0 %v1634_v35 }
  0x7d   :  { %802 = vmatprep.subr.bf16.mxu0 %v1642_v36 }
  0x80   :  { %803 = vmatpush1.bf16.msra.mxu0 %v1640_v37 }
  0x81   :  { %804 = vmatprep.subr.bf16.mxu0 %v1648_v38 }
  0x84   :  { %805 = vmatpush1.bf16.msra.mxu0 %v1646_v39 }
  0x85   :  { %806 = vmatprep.subr.bf16.mxu0 %v1654_v40 }
  0x88   :  { %807 = vmatpush1.bf16.msra.mxu0 %v1652_v41 }
  0x89   :  { %808 = vmatprep.subr.bf16.mxu0 %v1660_v42 }
  0x8c   :  { %809 = vmatpush1.bf16.msra.mxu0 %v1658_v43  ;;  %v1708_v43 = vld [vmem:[%s1957_s7] sm:$0xff]  }
  0x8d   :  { %810 = vmatprep.subr.bf16.mxu0 %v1666_v44 }
  0x90   :  { %811 = vmatpush1.bf16.msra.mxu0 %v1664_v45  ;;  %v1709_v45 = vld [vmem:[%s1957_s7 + $0x8] sm:$0xff]  }
  0x91   :  { %823 = vmatprep.subr.bf16.mxu0 %v1675_v46  ;;  %v1710_v46 = vld [vmem:[%s1957_s7 + $0x10] sm:$0xff]  }
  0x93   :  { %813 = vmatmul.mubr.bf16.vlgmr.msra.gmra.mrb[0].mxu0 %v1668_v47  ;;  %v1711_v47 = vld [vmem:[%s1957_s7 + $0x18] sm:$0xff]  }
  0x94   :  { %824 = vmatpush1.bf16.msra.mxu0 %v1673_v48  ;;  %855 = vmatprep.mubr.bf16.mxu0 %v1747_v49  ;;  %v1413_v48 = vld [vmem:[%s1956_s6] ss:$0 sm:$0xff] }
  0x9f   :  { %1395 = vmatmul.mubr.msk.bf16.vlgmr.msra.gmra.mrb[0].mxu0 %vm690_vm0, %v1683_v50 }
 0x12c   :  { %v728_v59 = vpop.f32.mrb[0].mxu1 }
 0x12d   :  { %v730_v60 = vpop.f32.mrb[1].mxu1  ;;  %v729_v6 = vadd.f32 %v728_v59, %v158_v4  ;;  %v1422_v59 = vld [vmem:[%s1958_s8] ss:$0 sm:$0xff] }
 0x12e   :  { %v732_v61 = vpop.f32.mrb[2].mxu1  ;;  %v731_v7 = vadd.f32 %v730_v60, %v162_v5 }
 0x12f   :  { %v734_v62 = vpop.f32.mrb[3].mxu1  ;;  %v733_v9 = vadd.f32 %v732_v61, %v158_v4 }
 0x130   :  { %v735_v12 = vadd.f32 %v734_v62, %v162_v5 }
 0x172   :  { %v857_v8 = vpop.f32.mrb[0].mxu0 }
 0x173   :  { %v1506_v10 = vadd.f32 %v857_v8, %v729_v6  ;;  %v859_v11 = vpop.f32.mrb[1].mxu0 }
 0x174   :  { %v1508_v13 = vadd.f32 %v859_v11, %v731_v7  ;;  %v861_v14 = vpop.f32.mrb[2].mxu0 }
 0x175   :  { %v1510_v15 = vadd.f32 %v861_v14, %v733_v9  ;;  %v863_v16 = vpop.f32.mrb[3].mxu0  ;;  %v866_v18 = vmax.f32 %v1506_v10, 0.0 }
 0x176   :  { %v1512_v17 = vadd.f32 %v863_v16, %v735_v12  ;;  %v867_v20 = vmax.f32 %v1508_v13, 0.0 }
 0x177   :  { %v868_v19 = vmax.f32 %v1510_v15, 0.0 }
 0x178   :  { %v869_v21 = vmax.f32 %v1512_v17, 0.0 }
 0x179   :  { %v870_v22 = vpack.c.bf16 %v868_v19, %v866_v18 }
 0x17a   :  { %v871_v23 = vpack.c.bf16 %v869_v21, %v867_v20 }
 0x17c   :  { %1039 = vmatprep.mubr.bf16.mxu1 %v871_v23 }
 0x17d   :  { %1040 = vmatmul.mubr.bf16.vlgmr.msra.gmra.mrb[4].mxu1 %v870_v22 }
 0x17e   :  { %1474 = vmatpush3.bf16.msra.mxu1 %v1700_v24  ;;  %1489 = vmatprep.mubr.msk.bf16.mxu1 %vm1749_vm1, %v1748_v58 }
 0x17f   :  { %1475 = vmatprep.subr.bf16.mxu1 %v1748_v58 }
 0x182   :  { %1476 = vmatpush3.bf16.msra.mxu1 %v1701_v25 }
 0x183   :  { %1477 = vmatprep.subr.bf16.mxu1 %v1748_v58 }
 0x186   :  { %1478 = vmatpush3.bf16.msra.mxu1 %v1702_v26 }
 0x187   :  { %1479 = vmatprep.subr.bf16.mxu1 %v1748_v58 }
 0x18a   :  { %1480 = vmatpush3.bf16.msra.mxu1 %v1703_v27 }
 0x18b   :  { %1481 = vmatprep.subr.bf16.mxu1 %v1748_v58 }
 0x18e   :  { %1482 = vmatpush3.bf16.msra.mxu1 %v1704_v28 }
 0x18f   :  { %1483 = vmatprep.subr.bf16.mxu1 %v1748_v58 }
 0x192   :  { %1484 = vmatpush3.bf16.msra.mxu1 %v1705_v29 }
 0x193   :  { %1485 = vmatprep.subr.bf16.mxu1 %v1748_v58 }
 0x196   :  { %1486 = vmatpush3.bf16.msra.mxu1 %v1706_v30 }
 0x197   :  { %1487 = vmatprep.subr.bf16.mxu1 %v1748_v58 }
 0x19a   :  { %1488 = vmatpush3.bf16.msra.mxu1 %v1707_v31 }
 0x19b   :  { %1493 = vmatprep.subr.bf16.mxu1 %v1748_v58 }
 0x250   :  { %v1453_v32 = vpop.f32.mrb[4].mxu1 }
 0x251   :  { %v1454_v34 = vpop.f32.mrb[5].mxu1 }
 0x252   :  { %v1455_v35 = vadd.f32 %v1454_v34, %v1453_v32  ;;  %v1456_v36 = vpop.f32.mrb[6].mxu1 }
 0x253   :  { %v1457_v37 = vpop.f32.mrb[7].mxu1 }
 0x254   :  { %v1042_v38 = vadd.f32 %v1455_v35, %v1396_v33  ;;  %v1458_v39 = vadd.f32 %v1457_v37, %v1456_v36 }
 0x256   :  { %v1045_v40 = vadd.f32 %v1458_v39, %v1396_v33  ;;  %v1048_v41 = vmax.f32 %v1042_v38, 0.0 }
 0x258   :  { %v1049_v42 = vmax.f32 %v1045_v40, 0.0 }
 0x25a   :  { %v1050_v44 = vpack.c.bf16 %v1049_v42, %v1048_v41 }
 0x25c   :  { %1490 = vmatmul.mubr.bf16.vlgmr.msra.gmra.mrb[8].mxu1 %v1050_v44 }
 0x25d   :  { %1494 = vmatpush3.bf16.msra.mxu1 %v1708_v43  ;;  %1501 = vmatprep.mubr.msk.bf16.mxu1 %vm1749_vm1, %v1748_v58 }
 0x25e   :  { %1495 = vmatprep.subr.bf16.mxu1 %v1748_v58 }
 0x261   :  { %1496 = vmatpush3.bf16.msra.mxu1 %v1709_v45 }
 0x262   :  { %1497 = vmatprep.subr.bf16.mxu1 %v1748_v58 }
 0x265   :  { %1498 = vmatpush3.bf16.msra.mxu1 %v1710_v46 }
 0x266   :  { %1499 = vmatprep.subr.bf16.mxu1 %v1748_v58  ;;  %v1251_v58 = vand.u32 127, %v155_v63 }
 0x268   :  { %vm1252_vm3 = vcmp.lt.s32.totalorder %v1251_v58, 10 }
 0x269   :  { %1500 = vmatpush3.bf16.msra.mxu1 %v1711_v47 }
 0x32f   :  { %v1156_v49 = vpop.f32.mrb[8].mxu1 }
 0x330   :  { %v1157_v50 = vadd.f32 %v1413_v48, %v1156_v49  ;;  %v1491_v51 = vpop.f32.mrb[9].mxu1 }
 0x331   :  { %v1159_v52 = vpop.f32.mrb[10].mxu1 }
 0x332   :  { %v1160_v53 = vadd.f32 %v1413_v48, %v1159_v52  ;;  %v1492_v54 = vpop.f32.mrb[11].mxu1  ;;  %v1163_v55 = vmax.f32 %v1157_v50, 0.0 }
 0x334   :  { %v1164_v56 = vmax.f32 %v1160_v53, 0.0 }
 0x336   :  { %v1165_v57 = vpack.c.bf16 %v1164_v56, %v1163_v55 }
 0x338   :  { %1502 = vmatmul.mubr.msk.bf16.vlgmr.msra.gmra.mrb[12].mxu1 %vm1205_vm2, %v1165_v57 }
 0x40b   :  { %v1243_v60 = vpop.f32.mrb[12].mxu1 }
 0x40c   :  { %v1244_v61 = vadd.f32 %v1422_v59, %v1243_v60  ;;  %v1503_v62 = vpop.f32.mrb[13].mxu1 }
 0x40d   :  { %v1246_v0 = vpop.f32.mrb[14].mxu1 }
 0x40e   :  { %v1247_v1 = vadd.f32 %v1422_v59, %v1246_v0  ;;  %v1504_v2 = vpop.f32.mrb[15].mxu1  ;;  %v1253_v3 = vsel %vm1252_vm3, %v1244_v61, -inf }
 0x40f   :  { %1255 = vmax.xlane.f32.xlu0 %v1253_v3 }
 0x410   :  { %v1254_v4 = vsel %vm1252_vm3, %v1247_v1, -inf }
 0x413   :  { %1257 = vmax.xlane.f32.xlu0 %v1254_v4 }
 0x49c   :  { %v1256_v5 = vpop.xlane.xlu0 %1255 }
 0x49d   :  { %v1259_v6 = vsub.f32 %v1253_v3, %v1256_v5 }
 0x49f   :  { %v1261_v7 = vmul.f32 1.442695, %v1259_v6 }
 0x4a0   :  { %v1258_v8 = vpop.xlane.xlu0 %1257 }
 0x4a1   :  { %v1260_v63 = vsub.f32 %v1254_v4, %v1258_v8  ;;  %1712 = vpow2.f32 %v1261_v7 }
 0x4a3   :  { %v1263_v9 = vmul.f32 1.442695, %v1260_v63 }
 0x4a5   :  { %1714 = vpow2.f32 %v1263_v9 }
 0x4ab   :  { %v1713_v10 = vpop.eup %1712 }
 0x4ac   :  { %1265 = vadd.xlane.f32.xlu1 %v1713_v10 }
 0x4af   :  { %v1715_v11 = vpop.eup %1714 }
 0x4b0   :  { %1267 = vadd.xlane.f32.xlu1 %v1715_v11 }
 0x539   :  { %v1266_v12 = vpop.xlane.xlu1 %1265 }
 0x53a   :  { %1716 = vlog2.f32 %v1266_v12 }
 0x53d   :  { %v1268_v13 = vpop.xlane.xlu1 %1267 }
 0x53e   :  { %1718 = vlog2.f32 %v1268_v13 }
 0x544   :  { %v1717_v14 = vpop.eup %1716 }
 0x545   :  { %v1270_v15 = vmul.f32 0.6931472, %v1717_v14 }
 0x547   :  { %v1273_v18 = vsub.f32 %v1259_v6, %v1270_v15 }
 0x548   :  { %v1719_v16 = vpop.eup %1718 }
 0x549   :  { %v1272_v17 = vmul.f32 0.6931472, %v1719_v16 }
 0x54b   :  { %v1274_v19 = vsub.f32 %v1260_v63, %v1272_v17 }
 0x54d   :  { %v1435_v20 = vpack.c.bf16 %v1274_v19, %v1273_v18 }
 0x54f   :  { %1436 = vst [vmem:[%s1959_s9] sm:$0xff] %v1435_v20  }
 0x550   :  { %1289 = vsyncpa [#allocation3], 1 }

</bundles_post_ra>
